<compile_context>
chip_gen: v7x
topology: tpu7x:2x2x1
jax: 0.10.0
libtpu: 0.0.40
codegen_flags: <defaults>
</compile_context>

<pallas_src>
import jax
import jax.numpy as jnp
from jax.experimental import pallas as pl
from jax.experimental.pallas import tpu as pltpu

K = 3          # kernel_size
STRIDE = 2     # up_factor
PAD = 1        # padding
OUT_PAD = 1    # output_padding
EPS = 1e-5     # InstanceNorm2d default eps


def _convT_in_relu_kernel(x_ref, w_ref, o_ref):
    """Fused (transposed-conv as one matmul) + InstanceNorm2d + ReLU.

    x_ref : (1, KKC, HW)  bf16  im2col taps of the zero-inserted padded input
    w_ref : (TC, KKC)     bf16  C_out tile of the flipped ConvTranspose weight
    o_ref : (1, TC, HW)   f32   output tile, already NCHW-flat
    """
    # Single MXU matmul, f32 accumulation: (TC, KKC) @ (KKC, HW) -> (TC, HW)
    y = jnp.dot(w_ref[...], x_ref[0], preferred_element_type=jnp.float32)

    # InstanceNorm2d (affine=False, biased variance), single pass over y.
    inv_hw = 1.0 / y.shape[1]
    s = jnp.sum(y, axis=1, keepdims=True)                  # (TC, 1)
    ss = jnp.sum(y * y, axis=1, keepdims=True)             # (TC, 1)
    mean = s * inv_hw
    var = jnp.maximum(ss * inv_hw - mean * mean, 0.0)
    y = (y - mean) * jax.lax.rsqrt(var + EPS)

    # ReLU
    o_ref[0] = jnp.maximum(y, 0.0).astype(o_ref.dtype)


def _pick_cout_tile(c_out):
    """Largest nice C_out tile that still yields >= 2 grid steps per batch."""
    for tc in (128, 64, 32, 16, 8):
        if c_out % tc == 0 and c_out // tc >= 2:
            return tc
    return c_out


@jax.jit
def conv_transpose2d_block(x_nchw, weight, bias=None):
    """x: (N, C_in, H, W); weight: (C_in, C_out, K, K) (PyTorch ConvTranspose2d).

    `bias` is accepted for API parity but never used: the following
    InstanceNorm(affine=False) cancels any per-channel constant exactly.
    """
    del bias
    N, C_in, H, W = x_nchw.shape
    C_out = weight.shape[1]
    H_out = (H - 1) * STRIDE - 2 * PAD + K + OUT_PAD
    W_out = (W - 1) * STRIDE - 2 * PAD + K + OUT_PAD
    HW = H_out * W_out
    KKC = K * K * C_in

    # ---- glue (plain JAX; stays in NCHW so there are no layout transposes) --
    x = x_nchw.astype(jnp.bfloat16)
    H_up = (H - 1) * STRIDE + 1
    W_up = (W - 1) * STRIDE + 1
    x_up = jnp.zeros((N, C_in, H_up, W_up), jnp.bfloat16)
    x_up = x_up.at[:, :, ::STRIDE, ::STRIDE].set(x)
    lo = K - 1 - PAD
    hi = K - 1 - PAD + OUT_PAD
    x_pad = jnp.pad(x_up, ((0, 0), (0, 0), (lo, hi), (lo, hi)))
    # x_pad spatial size = H_out + K - 1, so a stride-1 VALID conv gives H_out.

    # im2col taps ordered (dh, dw, ic), HW minor (lane) dim.
    # TODO(synk): the zero-insert + shifted-window gather stays as tiny XLA
    # glue; expressing the 2-D window reshape with HW on the lane axis inside
    # the kernel has no clean Pallas equivalent at this layout.
    taps = [
        x_pad[:, :, dh:dh + H_out, dw:dw + W_out].reshape(N, C_in, HW)
        for dh in range(K) for dw in range(K)
    ]
    x_taps = jnp.concatenate(taps, axis=1)                 # (N, KKC, HW) bf16

    # ConvTranspose weight (C_in, C_out, K, K) -> flipped stride-1 conv weight
    # laid out as (C_out, KKC) with the same (dh, dw, ic) ordering.
    w_mat = jnp.transpose(weight[:, :, ::-1, ::-1], (1, 2, 3, 0))
    w_mat = w_mat.reshape(C_out, KKC).astype(jnp.bfloat16)

    # ---- Pallas kernel: one matmul + instance norm + relu per (n, c) tile ---
    TC = _pick_cout_tile(C_out)
    assert C_out % TC == 0 and TC % 8 == 0, (C_out, TC)
    # TODO(synk): for much larger H*W (v7x 64 MiB VMEM), add an HW grid axis
    # with a two-pass instance norm; unnecessary at these block sizes.
    out_flat = pl.pallas_call(
        _convT_in_relu_kernel,
        out_shape=jax.ShapeDtypeStruct((N, C_out, HW), jnp.float32),
        grid_spec=pltpu.PrefetchScalarGridSpec(
            num_scalar_prefetch=0,
            grid=(N, C_out // TC),
            in_specs=[
                pl.BlockSpec((1, KKC, HW), lambda n, c: (n, 0, 0)),
                pl.BlockSpec((TC, KKC), lambda n, c: (c, 0)),
            ],
            out_specs=pl.BlockSpec((1, TC, HW), lambda n, c: (n, c, 0)),
        ),
        compiler_params=pltpu.CompilerParams(
            dimension_semantics=("parallel", "parallel"),
        ),
    )(x_taps, w_mat)

    # (N, C_out, HW) is already NCHW-flat: a free metadata reshape, no transpose.
    return out_flat.reshape(N, C_out, H_out, W_out)


def _reference(x_nchw, weight, bias):
    """Pure-JAX f32 reference: lhs-dilated conv == ConvTranspose2d, then IN + ReLU."""
    kernel = jnp.transpose(weight, (1, 0, 2, 3))[:, :, ::-1, ::-1]   # OIHW, flipped
    y = jax.lax.conv_general_dilated(
        x_nchw.astype(jnp.float32), kernel.astype(jnp.float32),
        window_strides=(1, 1),
        padding=((K - 1 - PAD, K - 1 - PAD + OUT_PAD),
                 (K - 1 - PAD, K - 1 - PAD + OUT_PAD)),
        lhs_dilation=(STRIDE, STRIDE),
        dimension_numbers=("NCHW", "OIHW", "NCHW"),
        precision=jax.lax.Precision.HIGHEST,
    ) + bias.reshape(1, -1, 1, 1)
    mean = jnp.mean(y, axis=(2, 3), keepdims=True)
    var = jnp.mean(jnp.square(y - mean), axis=(2, 3), keepdims=True)
    return jnp.maximum((y - mean) * jax.lax.rsqrt(var + EPS), 0.0)


if __name__ == "__main__":
    # Small deterministic shapes consistent with the module's forward:
    # batch=2, in_channels=3, out_channels=128, spatial 16x16 -> 32x32.
    N, C_in, C_out, H, W = 2, 3, 128, 16, 16

    key = jax.random.PRNGKey(0)
    k1, k2, k3 = jax.random.split(key, 3)
    weight = jax.random.normal(k1, (C_in, C_out, K, K), jnp.float32) * 0.1
    bias = jax.random.normal(k2, (C_out,), jnp.float32) * 0.1
    x = jax.random.normal(k3, (N, C_in, H, W), jnp.float32)

    out = jax.block_until_ready(conv_transpose2d_block(x, weight, bias))
    assert out.shape == (N, C_out, 2 * H, 2 * W), out.shape

    ref = jax.block_until_ready(_reference(x, weight, bias))
    max_err = float(jnp.max(jnp.abs(out - ref)))
    # bf16 matmul inputs vs f32 reference -> loosened tolerance.
    assert jnp.allclose(out, ref, atol=3e-2, rtol=3e-2), max_err

    print("KERNEL_OK")
</pallas_src>

<mosaic_0001>
module attributes {stable_mosaic.version = 11 : i64} {
  func.func @_convT_in_relu_kernel(%arg0: i32, %arg1: i32, %arg2: memref<1x27x1024xbf16, #tpu.memory_space<vmem>>, %arg3: memref<64x27xbf16, #tpu.memory_space<vmem>>, %arg4: memref<1x64x1024xf32, #tpu.memory_space<vmem>>) attributes {dimension_semantics = [#tpu.dimension_semantics<parallel>, #tpu.dimension_semantics<parallel>], iteration_bounds = array<i64: 2, 2>, scalar_prefetch = 0 : i64, scratch_operands = 0 : i64, tpu.core_type = #tpu.core_type<tc>, window_params = [{transform_indices = @transform_0, window_bounds = array<i64: 1, 27, 1024>}, {transform_indices = @transform_1, window_bounds = array<i64: 64, 27>}, {transform_indices = @transform_2, window_bounds = array<i64: 1, 64, 1024>}]} {
    %c0 = arith.constant 0 : index
    %c0_0 = arith.constant 0 : index
    %0 = vector.load %arg3[%c0, %c0_0] : memref<64x27xbf16, #tpu.memory_space<vmem>>, vector<64x27xbf16>
    %c0_1 = arith.constant 0 : index
    %c0_2 = arith.constant 0 : index
    %c0_3 = arith.constant 0 : index
    %1 = vector.load %arg2[%c0_1, %c0_2, %c0_3] : memref<1x27x1024xbf16, #tpu.memory_space<vmem>>, vector<1x27x1024xbf16>
    %2 = vector.shape_cast %1 : vector<1x27x1024xbf16> to vector<27x1024xbf16>
    %cst = arith.constant dense<0.000000e+00> : vector<64x1024xf32>
    %3 = tpu.matmul %0, %2, %cst {dimension_numbers = #tpu.dot_dimension_numbers<[1], [0], [0], [1], [0, 0, 1, 1], [], []>} : vector<64x27xbf16>, vector<27x1024xbf16>, vector<64x1024xf32> -> vector<64x1024xf32>
    %cst_4 = arith.constant dense<0.000000e+00> : vector<64xf32>
    %4 = vector.multi_reduction <add>, %3, %cst_4 [1] : vector<64x1024xf32> to vector<64xf32>
    %5 = vector.shape_cast %4 : vector<64xf32> to vector<64x1xf32>
    %6 = arith.mulf %3, %3 : vector<64x1024xf32>
    %cst_5 = arith.constant dense<0.000000e+00> : vector<64xf32>
    %7 = vector.multi_reduction <add>, %6, %cst_5 [1] : vector<64x1024xf32> to vector<64xf32>
    %8 = vector.shape_cast %7 : vector<64xf32> to vector<64x1xf32>
    %cst_6 = arith.constant 9.765625E-4 : f32
    %9 = vector.broadcast %cst_6 : f32 to vector<64x1xf32>
    %10 = arith.mulf %5, %9 : vector<64x1xf32>
    %cst_7 = arith.constant 9.765625E-4 : f32
    %11 = vector.broadcast %cst_7 : f32 to vector<64x1xf32>
    %12 = arith.mulf %8, %11 : vector<64x1xf32>
    %13 = arith.mulf %10, %10 : vector<64x1xf32>
    %14 = arith.subf %12, %13 : vector<64x1xf32>
    %cst_8 = arith.constant 0.000000e+00 : f32
    %15 = vector.broadcast %cst_8 : f32 to vector<64x1xf32>
    %16 = arith.maximumf %14, %15 : vector<64x1xf32>
    %17 = vector.broadcast %10 : vector<64x1xf32> to vector<64x1024xf32>
    %18 = arith.subf %3, %17 : vector<64x1024xf32>
    %cst_9 = arith.constant 9.99999974E-6 : f32
    %19 = vector.broadcast %cst_9 : f32 to vector<64x1xf32>
    %20 = arith.addf %16, %19 : vector<64x1xf32>
    %21 = math.rsqrt %20 : vector<64x1xf32>
    %22 = vector.broadcast %21 : vector<64x1xf32> to vector<64x1024xf32>
    %23 = arith.mulf %18, %22 : vector<64x1024xf32>
    %cst_10 = arith.constant 0.000000e+00 : f32
    %24 = vector.broadcast %cst_10 : f32 to vector<64x1024xf32>
    %25 = arith.maximumf %23, %24 : vector<64x1024xf32>
    %c0_11 = arith.constant 0 : index
    %c0_12 = arith.constant 0 : index
    %c0_13 = arith.constant 0 : index
    %26 = vector.load %arg4[%c0_11, %c0_12, %c0_13] : memref<1x64x1024xf32, #tpu.memory_space<vmem>>, vector<1x64x1024xf32>
    %27 = vector.shape_cast %26 : vector<1x64x1024xf32> to vector<64x1024xf32>
    %28 = vector.shape_cast %25 : vector<64x1024xf32> to vector<1x64x1024xf32>
    tpu.vector_store %arg4[%c0_11, %c0_12, %c0_13], %28 {strides = array<i32>} : memref<1x64x1024xf32, #tpu.memory_space<vmem>>, vector<1x64x1024xf32>,
    return
  }
  func.func @transform_0(%arg0: i32, %arg1: i32) -> (i32, i32, i32) {
    %c0_i32 = arith.constant 0 : i32
    %c0_i32_0 = arith.constant 0 : i32
    %c0_i32_1 = arith.constant 0 : i32
    return %arg0, %c0_i32, %c0_i32_0 : i32, i32, i32
  }
  func.func @transform_1(%arg0: i32, %arg1: i32) -> (i32, i32) {
    %c0_i32 = arith.constant 0 : i32
    %c0_i32_0 = arith.constant 0 : i32
    return %arg1, %c0_i32 : i32, i32
  }
  func.func @transform_2(%arg0: i32, %arg1: i32) -> (i32, i32, i32) {
    %c0_i32 = arith.constant 0 : i32
    %c0_i32_0 = arith.constant 0 : i32
    return %arg0, %arg1, %c0_i32 : i32, i32, i32
  }
}

</mosaic_0001>

<bundles_post_ra>
// kernel: conv_transpose2d_block.1
= control target key start
LH: loop header
LB: loop body
LE: loop exit
PB: predicated region body
PF: predicated region fallthrough
CT: control target
= control target key end

     0   :  { %s1434_s9 = smov 0   ;;  %s1436_s10 = smov 0   ;;  %s2198_s0 = inlined_call_operand.vmem [shape: bf16[2,27,1024], index: 0, kind: input, shape index: {}]   ;;  %s2199_s1 = inlined_call_operand.vmem [shape: bf16[128,27], index: 1, kind: input, shape index: {}]   ;;  %s2200_s2 = inlined_call_operand.vmem [shape: f32[2,128,1024], index: 2, kind: output, shape index: {}]  }
   0x1   :  { %s1438_s11 = smov 0   ;;  %s1440_s12 = smov 0  }
   0x2   :  { %s1442_s13 = smov 0  }
   0x3 LB: > { %s21_s14 = sadd.s32 1, %s1407_s11  ;;  %s24_s15 = sadd.s32 1, %s1411_s12  ;;  %s1415_s13 = sphi %s1442_s13, %s12_s13   ;;  %s1411_s12 = sphi %s1440_s12, %s2286_s12   ;;  %s1407_s11 = sphi %s1438_s11, %s2285_s11   ;;  %s1403_s10 = sphi %s1436_s10, %s2284_s10   ;;  %s1399_s9 = sphi %s1434_s9, %s2283_s9  }
   0x4   : > { %p22_p0 = scmp.ge.s32.totalorder %s21_s14, 2  ;;  %p1267_p1 = scmp.ge.s32.totalorder %s1415_s13, 1 }
   0x5   : > { %p137_p2 = scmp.lt.s32.totalorder %s1415_s13, 5 }
   0x6   : > { %s2288_s14 = smov (%p22_p0, %s21_s14), 0  ;;  %s2290_s15 = smov (!%p22_p0, %s24_s15), %s1411_s12 }
   0x7   : > { %p138_p3 = pnand %p1267_p1, %p137_p2  ;;  %p26_p4 = scmp.ge.s32.totalorder %s2290_s15, 2 }
   0x9   : > { %s2292_s15 = smov (%p26_p4, %s2290_s15), 0  ;;  %141 = sbr.rel (%p138_p3) target bundleno = 511 (0x1ff), region = 28 }
  0x10   : > { %p169_p5 = scmp.lt.s32.totalorder %s1403_s10, 1  ;;  %s1270_s16 = sshll.u32 %s1399_s9, 3  ;;  %vm321_vm0 = vcmask 1044480   ;;  %v1417_v0 = vmov 0   ;;  %vm322_vm1 = vcmask 1045504   ;;  %v1418_v1 = vmov 65535  }
  0x11   : > { %381 = vmatprep.mubr.bf16.mxu0 %v1417_v0  ;;  %p175_p6 = scmp.lt.s32.totalorder %s1270_s16, 15  ;;  %454 = vmatprep.mubr.bf16.mxu1 %v1417_v0  ;;  %v323_v2 = vsel %vm321_vm0, 4294967295, %v1418_v1  ;;  %vm308_vm2 = vcmask 220160  }
  0x12   : > { %s2294_s10 = smov (!%p169_p5, %s1403_s10), 1  ;;  %v324_v11 = vsel %vm322_vm1, %v323_v2, 0 }
  0x13   : > { %s2296_s16 = smov (!%p175_p6, %s1270_s16), 15  ;;  %s1314_s17 = sshll.u32 %s2294_s10, 7 }
  0x14   : > { %s1469_s20 = scalar_lea.vmem %s2198_s0, %s1314_s17  ;;  %s1271_s21 = sshll.u32 %s2296_s16, 2 }
  0x15   : > { %v200_v3 = vld [vmem:[%s1469_s20] sm:$0xff]  ;;  %v201_v5 = vld [vmem:[%s1469_s20 + $0x8] sm:$0xff]  ;;  %s1273_s22 = sshll.u32 %s2296_s16, 3  ;;  %s1480_s25 = scalar_lea.vmem %s2199_s1, %s1271_s21  ;;  %v202_v20 = vld [vmem:[%s1469_s20 + $0x10] sm:$0xff] }
  0x16   : > { %v204_v4 = vld [vmem:[%s1469_s20 + $0x20] sm:$0xff]  ;;  %v205_v8 = vld [vmem:[%s1469_s20 + $0x28] sm:$0xff]  ;;  %s1482_s26 = sadd.s32 %s1314_s17, %s1273_s22  ;;  %v206_v23 = vld [vmem:[%s1469_s20 + $0x30] sm:$0xff] }
  0x17   : > { %v1281_v6 = vcombine.high %v200_v3, %v204_v4  ;;  %v1280_v7 = vcombine.low %v200_v3, %v204_v4  ;;  %v208_v9 = vld [vmem:[%s1469_s20 + $0x40] sm:$0xff]  ;;  %v1283_v12 = vcombine.high %v201_v5, %v205_v8  ;;  %v1282_v13 = vcombine.low %v201_v5, %v205_v8  ;;  %v209_v16 = vld [vmem:[%s1469_s20 + $0x48] sm:$0xff]  ;;  %v203_v24 = vld [vmem:[%s1469_s20 + $0x18] sm:$0xff]  ;;  %s1275_s27 = sshll.u32 %s1482_s26, 3 }
  0x18   : > { %v212_v10 = vld [vmem:[%s1469_s20 + $0x60] sm:$0x33]  ;;  %v213_v17 = vld [vmem:[%s1469_s20 + $0x68] sm:$0x33]  ;;  %v207_v25 = vld [vmem:[%s1469_s20 + $0x38] sm:$0xff]  ;;  %v1285_v28 = vcombine.high %v202_v20, %v206_v23  ;;  %v1284_v34 = vcombine.low %v202_v20, %v206_v23  ;;  %s1976_s30 = scalar_lea.vmem %s2200_s2, %s1275_s27 }
  0x19   : > { %v1289_v14 = vcombine.high %v208_v9, %v212_v10  ;;  %v1288_v15 = vcombine.low %v208_v9, %v212_v10  ;;  %349 = vmatprep.subr.bf16.mxu0 %v1281_v6  ;;  %v1291_v18 = vcombine.high %v209_v16, %v213_v17  ;;  %v1290_v19 = vcombine.low %v209_v16, %v213_v17  ;;  %v1357_v29 = vld [vmem:[%s1480_s25] sm:$0xff]   ;;  %v210_v31 = vld [vmem:[%s1469_s20 + $0x50] sm:$0xff]  ;;  %v211_v33 = vld [vmem:[%s1469_s20 + $0x58] sm:$0xff] }
  0x1a   : > { %350 = vmatpush1.bf16.msra.mxu0 %v1280_v7  ;;  %422 = vmatprep.subr.bf16.mxu1 %v1283_v12  ;;  %v1287_v30 = vcombine.high %v203_v24, %v207_v25  ;;  %v214_v32 = vld [vmem:[%s1469_s20 + $0x70] sm:$0x33]  ;;  %v215_v37 = vld [vmem:[%s1469_s20 + $0x78] sm:$0x33]  ;;  %v1286_v38 = vcombine.low %v203_v24, %v207_v25  ;;  %v1358_v45 = vld [vmem:[%s1480_s25 + $0x8] sm:$0xff]  }
  0x1b   : > { %v329_v21 = vand.u32 %v1289_v14, %v324_v11  ;;  %v326_v22 = vand.u32 %v1288_v15, %v324_v11  ;;  %423 = vmatpush1.bf16.msra.mxu1 %v1282_v13  ;;  %v335_v26 = vand.u32 %v1291_v18, %v324_v11  ;;  %v332_v27 = vand.u32 %v1290_v19, %v324_v11  ;;  %v1359_v46 = vld [vmem:[%s1480_s25 + $0x10] sm:$0xff]   ;;  %v1360_v47 = vld [vmem:[%s1480_s25 + $0x18] sm:$0xff]  }
  0x1c   : > { %v1292_v35 = vcombine.low %v210_v31, %v214_v32  ;;  %v1293_v36 = vcombine.high %v210_v31, %v214_v32  ;;  %v1294_v39 = vcombine.low %v211_v33, %v215_v37  ;;  %v1295_v40 = vcombine.high %v211_v33, %v215_v37 }
  0x1d   : > { %351 = vmatprep.subr.bf16.mxu0 %v329_v21  ;;  %424 = vmatprep.subr.bf16.mxu1 %v335_v26 }
  0x1e   : > { %352 = vmatpush1.bf16.msra.mxu0 %v326_v22  ;;  %v341_v41 = vand.u32 %v1293_v36, %v324_v11  ;;  %v347_v42 = vand.u32 %v1295_v40, %v324_v11  ;;  %v338_v43 = vand.u32 %v1292_v35, %v324_v11  ;;  %v344_v44 = vand.u32 %v1294_v39, %v324_v11 }
  0x1f   : > { %425 = vmatpush1.bf16.msra.mxu1 %v332_v27  ;;  %495 = vmatprep.subr.bf16.mxu0 %v1285_v28 }
  0x20   : > { %568 = vmatprep.subr.bf16.mxu1 %v1287_v30 }
  0x21   : > { %1296 = vmatmul.mubr.msk.bf16.vlgmr.msra.gmra.mrb[0].mxu0 %vm308_vm2, %v1357_v29 }
  0x22   : > { %496 = vmatpush1.bf16.msra.mxu0 %v1284_v34  ;;  %1300 = vmatmul.mubr.msk.bf16.vlgmr.msra.gmra.mrb[0].mxu1 %vm308_vm2, %v1357_v29 }
  0x23   : > { %569 = vmatpush1.bf16.msra.mxu1 %v1286_v38  ;;  %391 = vmatprep.mubr.bf16.mxu0 %v1417_v0 }
  0x24   : > { %464 = vmatprep.mubr.bf16.mxu1 %v1417_v0  ;;  %497 = vmatprep.subr.bf16.mxu0 %v341_v41 }
  0x25   : > { %570 = vmatprep.subr.bf16.mxu1 %v347_v42 }
  0x26   : > { %498 = vmatpush1.bf16.msra.mxu0 %v338_v43 }
  0x27   : > { %571 = vmatpush1.bf16.msra.mxu1 %v344_v44 }
  0x29   : > { %1297 = vmatmul.mubr.msk.bf16.gmra.mrb[4].mxu0 %vm308_vm2, %v1358_v45 }
  0x2a   : > { %1301 = vmatmul.mubr.msk.bf16.gmra.mrb[4].mxu1 %vm308_vm2, %v1358_v45  ;;  %401 = vmatprep.mubr.bf16.mxu0 %v1417_v0 }
  0x2b   : > { %474 = vmatprep.mubr.bf16.mxu1 %v1417_v0 }
  0x31   : > { %1298 = vmatmul.mubr.msk.bf16.gmra.mrb[8].mxu0 %vm308_vm2, %v1359_v46 }
  0x32   : > { %1302 = vmatmul.mubr.msk.bf16.gmra.mrb[8].mxu1 %vm308_vm2, %v1359_v46  ;;  %411 = vmatprep.mubr.bf16.mxu0 %v1417_v0 }
  0x33   : > { %484 = vmatprep.mubr.bf16.mxu1 %v1417_v0 }
  0x39   : > { %1299 = vmatmul.mubr.msk.bf16.gmra.mrb[12].mxu0 %vm308_vm2, %v1360_v47 }
  0x3a   : > { %1303 = vmatmul.mubr.msk.bf16.gmra.mrb[12].mxu1 %vm308_vm2, %v1360_v47  ;;  %527 = vmatprep.mubr.bf16.mxu0 %v1417_v0 }
  0x3b   : > { %600 = vmatprep.mubr.bf16.mxu1 %v1417_v0 }
  0x41   : > { %1304 = vmatmul.mubr.msk.bf16.vlgmr.msra.gmra.mrb[16].mxu0 %vm308_vm2, %v1357_v29 }
  0x42   : > { %1308 = vmatmul.mubr.msk.bf16.vlgmr.msra.gmra.mrb[16].mxu1 %vm308_vm2, %v1357_v29  ;;  %537 = vmatprep.mubr.bf16.mxu0 %v1417_v0 }
  0x43   : > { %610 = vmatprep.mubr.bf16.mxu1 %v1417_v0 }
  0x49   : > { %1305 = vmatmul.mubr.msk.bf16.gmra.mrb[20].mxu0 %vm308_vm2, %v1358_v45 }
  0x4a   : > { %1309 = vmatmul.mubr.msk.bf16.gmra.mrb[20].mxu1 %vm308_vm2, %v1358_v45  ;;  %547 = vmatprep.mubr.bf16.mxu0 %v1417_v0 }
  0x4b   : > { %620 = vmatprep.mubr.bf16.mxu1 %v1417_v0 }
  0x51   : > { %1306 = vmatmul.mubr.msk.bf16.gmra.mrb[24].mxu0 %vm308_vm2, %v1359_v46 }
  0x52   : > { %1310 = vmatmul.mubr.msk.bf16.gmra.mrb[24].mxu1 %vm308_vm2, %v1359_v46  ;;  %557 = vmatprep.mubr.bf16.mxu0 %v1417_v0 }
  0x53   : > { %630 = vmatprep.mubr.bf16.mxu1 %v1417_v0 }
  0x59   : > { %1307 = vmatmul.mubr.msk.bf16.gmra.mrb[28].mxu0 %vm308_vm2, %v1360_v47 }
  0x5a   : > { %1311 = vmatmul.mubr.msk.bf16.gmra.mrb[28].mxu1 %vm308_vm2, %v1360_v47 }
  0xf4   : > { %v1528_v48 = vpop.f32.mrb[0].mxu0 }
  0xf5   : > { %v713_v49 = vmul.f32 %v1528_v48, %v1528_v48  ;;  %v1532_v50 = vpop.f32.mrb[1].mxu0  ;;  %v1534_v51 = vpop.f32.mrb[0].mxu1 }
  0xf6   : > { %v641_v52 = vadd.f32 %v1532_v50, %v1528_v48  ;;  %v714_v53 = vmul.f32 %v1532_v50, %v1532_v50  ;;  %v1540_v54 = vpop.f32.mrb[2].mxu0  ;;  %v715_v55 = vmul.f32 %v1534_v51, %v1534_v51  ;;  %v1544_v56 = vpop.f32.mrb[1].mxu1 }
  0xf7   : > { %v721_v57 = vmul.f32 %v1540_v54, %v1540_v54  ;;  %v1548_v58 = vpop.f32.mrb[3].mxu0  ;;  %v716_v59 = vmul.f32 %v1544_v56, %v1544_v56  ;;  %v1552_v60 = vpop.f32.mrb[2].mxu1 }
  0xf8   : > { %v777_v61 = vadd.f32 %v714_v53, %v713_v49  ;;  %v642_v62 = vadd.f32 %v641_v52, %v1534_v51  ;;  %v650_v63 = vadd.f32 %v1548_v58, %v1540_v54  ;;  %v722_v0 = vmul.f32 %v1548_v58, %v1548_v58  ;;  %v1559_v1 = vpop.f32.mrb[3].mxu1 }
  0xf9   : > { %v723_v2 = vmul.f32 %v1552_v60, %v1552_v60  ;;  %v724_v10 = vmul.f32 %v1559_v1, %v1559_v1 }
  0xfa   : > { %v778_v3 = vadd.f32 %v777_v61, %v715_v55  ;;  %v786_v4 = vadd.f32 %v722_v0, %v721_v57  ;;  %v1564_v5 = vadd.f32 %v642_v62, %v1544_v56  ;;  %v651_v6 = vadd.f32 %v650_v63, %v1552_v60 }
  0xfc   : > { %v1567_v7 = vadd.f32 %v778_v3, %v716_v59  ;;  %v787_v8 = vadd.f32 %v786_v4, %v723_v2  ;;  %v1570_v9 = vadd.f32 %v651_v6, %v1559_v1  ;;  %v1574_v11 = vpop.f32.mrb[4].mxu0 }
  0xfd   : > { %v729_v12 = vmul.f32 %v1574_v11, %v1574_v11  ;;  %v1578_v13 = vpop.f32.mrb[5].mxu0  ;;  %v1580_v14 = vpop.f32.mrb[4].mxu1 }
  0xfe   : > { %v1582_v15 = vadd.f32 %v787_v8, %v724_v10  ;;  %v659_v16 = vadd.f32 %v1578_v13, %v1574_v11  ;;  %v730_v17 = vmul.f32 %v1578_v13, %v1578_v13  ;;  %v1588_v18 = vpop.f32.mrb[6].mxu0  ;;  %v731_v19 = vmul.f32 %v1580_v14, %v1580_v14  ;;  %v1592_v20 = vpop.f32.mrb[5].mxu1 }
  0xff   : > { %v737_v21 = vmul.f32 %v1588_v18, %v1588_v18  ;;  %v1596_v22 = vpop.f32.mrb[7].mxu0  ;;  %v732_v23 = vmul.f32 %v1592_v20, %v1592_v20  ;;  %v1600_v24 = vpop.f32.mrb[6].mxu1 }
 0x100   : > { %v795_v25 = vadd.f32 %v730_v17, %v729_v12  ;;  %v660_v26 = vadd.f32 %v659_v16, %v1580_v14  ;;  %v668_v27 = vadd.f32 %v1596_v22, %v1588_v18  ;;  %v738_v28 = vmul.f32 %v1596_v22, %v1596_v22  ;;  %v1607_v29 = vpop.f32.mrb[7].mxu1 }
 0x101   : > { %v739_v30 = vmul.f32 %v1600_v24, %v1600_v24  ;;  %v740_v38 = vmul.f32 %v1607_v29, %v1607_v29 }
 0x102   : > { %v796_v31 = vadd.f32 %v795_v25, %v731_v19  ;;  %v804_v32 = vadd.f32 %v738_v28, %v737_v21  ;;  %v1612_v33 = vadd.f32 %v660_v26, %v1592_v20  ;;  %v669_v34 = vadd.f32 %v668_v27, %v1600_v24 }
 0x104   : > { %v1615_v35 = vadd.f32 %v796_v31, %v732_v23  ;;  %v805_v36 = vadd.f32 %v804_v32, %v739_v30  ;;  %v1618_v37 = vadd.f32 %v669_v34, %v1607_v29  ;;  %v1622_v39 = vpop.f32.mrb[8].mxu0 }
 0x105   : > { %v745_v40 = vmul.f32 %v1622_v39, %v1622_v39  ;;  %v1626_v41 = vpop.f32.mrb[9].mxu0  ;;  %v1628_v42 = vpop.f32.mrb[8].mxu1 }
 0x106   : > { %2223 = vst [vmem:[#allocation2_spill] sm:$0xff] %v1626_v41  ;;  %2224 = vst [vmem:[#allocation3_spill] sm:$0xff] %v1628_v42  ;;  %v1630_v43 = vadd.f32 %v805_v36, %v740_v38  ;;  %v677_v44 = vadd.f32 %v1626_v41, %v1622_v39  ;;  %v746_v45 = vmul.f32 %v1626_v41, %v1626_v41  ;;  %v1636_v46 = vpop.f32.mrb[10].mxu0  ;;  %v1640_v49 = vpop.f32.mrb[9].mxu1 }
 0x107   : > { %2225 = vst [vmem:[#allocation4_spill] sm:$0xff] %v1636_v46  ;;  %v747_v47 = vmul.f32 %v1628_v42, %v1628_v42  ;;  %2226 = vst [vmem:[#allocation5_spill] sm:$0xff] %v1640_v49  ;;  %v753_v52 = vmul.f32 %v1636_v46, %v1636_v46  ;;  %v1644_v53 = vpop.f32.mrb[11].mxu0  ;;  %v748_v55 = vmul.f32 %v1640_v49, %v1640_v49  ;;  %v1648_v57 = vpop.f32.mrb[10].mxu1 }
 0x108   : > { %2227 = vst [vmem:[#allocation6_spill] sm:$0xff] %v1644_v53  ;;  %2228 = vst [vmem:[#allocation7_spill] sm:$0xff] %v1648_v57  ;;  %v813_v59 = vadd.f32 %v746_v45, %v745_v40  ;;  %v678_v61 = vadd.f32 %v677_v44, %v1628_v42  ;;  %v686_v62 = vadd.f32 %v1644_v53, %v1636_v46  ;;  %v1655_v0 = vpop.f32.mrb[11].mxu1 }
 0x109   : > { %v754_v63 = vmul.f32 %v1644_v53, %v1644_v53  ;;  %2229 = vst [vmem:[#allocation8_spill] sm:$0xff] %v1655_v0  ;;  %v755_v2 = vmul.f32 %v1648_v57, %v1648_v57  ;;  %v756_v17 = vmul.f32 %v1655_v0, %v1655_v0 }
 0x10a   : > { %v814_v3 = vadd.f32 %v813_v59, %v747_v47  ;;  %v1660_v6 = vadd.f32 %v678_v61, %v1640_v49  ;;  %v687_v8 = vadd.f32 %v686_v62, %v1648_v57 }
 0x10b   : > { %v822_v4 = vadd.f32 %v754_v63, %v753_v52 }
 0x10c   : > { %v1663_v10 = vadd.f32 %v814_v3, %v748_v55  ;;  %v1666_v16 = vadd.f32 %v687_v8, %v1655_v0  ;;  %v1670_v19 = vpop.f32.mrb[12].mxu0 }
 0x10d   : > { %v823_v12 = vadd.f32 %v822_v4, %v755_v2  ;;  %2230 = vst [vmem:[#allocation9_spill] sm:$0xff] %v1670_v19  ;;  %v761_v21 = vmul.f32 %v1670_v19, %v1670_v19  ;;  %v1674_v23 = vpop.f32.mrb[13].mxu0  ;;  %v1676_v25 = vpop.f32.mrb[12].mxu1 }
 0x10e   : > { %2231 = vst [vmem:[#allocation10_spill] sm:$0xff] %v1674_v23  ;;  %2232 = vst [vmem:[#allocation11_spill] sm:$0xff] %v1676_v25  ;;  %v695_v27 = vadd.f32 %v1674_v23, %v1670_v19  ;;  %v762_v28 = vmul.f32 %v1674_v23, %v1674_v23  ;;  %v1684_v30 = vpop.f32.mrb[14].mxu0  ;;  %v763_v31 = vmul.f32 %v1676_v25, %v1676_v25  ;;  %v1688_v32 = vpop.f32.mrb[13].mxu1 }
 0x10f   : > { %v1678_v26 = vadd.f32 %v823_v12, %v756_v17  ;;  %2233 = vst [vmem:[#allocation12_spill] sm:$0xff] %v1684_v30  ;;  %2234 = vst [vmem:[#allocation13_spill] sm:$0xff] %v1688_v32  ;;  %v769_v34 = vmul.f32 %v1684_v30, %v1684_v30  ;;  %v1692_v36 = vpop.f32.mrb[15].mxu0  ;;  %v764_v38 = vmul.f32 %v1688_v32, %v1688_v32  ;;  %v1696_v40 = vpop.f32.mrb[14].mxu1 }
 0x110   : > { %2235 = vst [vmem:[#allocation14_spill] sm:$0xff] %v1692_v36  ;;  %2236 = vst [vmem:[#allocation15_spill] sm:$0xff] %v1696_v40  ;;  %v831_v44 = vadd.f32 %v762_v28, %v761_v21  ;;  %v696_v45 = vadd.f32 %v695_v27, %v1676_v25  ;;  %v704_v47 = vadd.f32 %v1692_v36, %v1684_v30  ;;  %v1703_v55 = vpop.f32.mrb[15].mxu1 }
 0x111   : > { %v770_v52 = vmul.f32 %v1692_v36, %v1692_v36  ;;  %2237 = vst [vmem:[#allocation16_spill] sm:$0xff] %v1703_v55  ;;  %v771_v59 = vmul.f32 %v1696_v40, %v1696_v40  ;;  %v772_v12 = vmul.f32 %v1703_v55, %v1703_v55 }
 0x112   : > { %v832_v61 = vadd.f32 %v831_v44, %v763_v31  ;;  %v1708_v63 = vadd.f32 %v696_v45, %v1688_v32  ;;  %v705_v2 = vadd.f32 %v704_v47, %v1696_v40 }
 0x113   : > { %v840_v62 = vadd.f32 %v770_v52, %v769_v34 }
 0x114   : > { %v1711_v3 = vadd.f32 %v832_v61, %v764_v38  ;;  %v1714_v8 = vadd.f32 %v705_v2, %v1703_v55  ;;  %v1718_v17 = vpop.f32.mrb[16].mxu0 }
 0x115   : > { %v841_v4 = vadd.f32 %v840_v62, %v771_v59  ;;  %v644_v21 = vadd.f32 %v1564_v5, %v1718_v17  ;;  %v717_v27 = vmul.f32 %v1718_v17, %v1718_v17  ;;  %v1724_v28 = vpop.f32.mrb[17].mxu0  ;;  %v1726_v31 = vpop.f32.mrb[16].mxu1 }
 0x116   : > { %v718_v38 = vmul.f32 %v1724_v28, %v1724_v28  ;;  %v1732_v44 = vpop.f32.mrb[18].mxu0  ;;  %v1734_v45 = vpop.f32.mrb[17].mxu1  ;;  %v719_v2 = vmul.f32 %v1726_v31, %v1726_v31 }
 0x117   : > { %v1728_v34 = vadd.f32 %v841_v4, %v772_v12  ;;  %v780_v47 = vadd.f32 %v1567_v7, %v717_v27  ;;  %v645_v5 = vadd.f32 %v644_v21, %v1724_v28  ;;  %v653_v52 = vadd.f32 %v1570_v9, %v1732_v44  ;;  %v1742_v61 = vpop.f32.mrb[19].mxu0  ;;  %v1744_v62 = vpop.f32.mrb[18].mxu1 }
 0x118   : > { %v725_v59 = vmul.f32 %v1732_v44, %v1732_v44  ;;  %v726_v4 = vmul.f32 %v1742_v61, %v1742_v61  ;;  %v1750_v12 = vpop.f32.mrb[19].mxu1  ;;  %v727_v55 = vmul.f32 %v1744_v62, %v1744_v62  ;;  %v720_v25 = vmul.f32 %v1734_v45, %v1734_v45 }
 0x119   : > { %v654_v21 = vadd.f32 %v653_v52, %v1742_v61  ;;  %v646_v9 = vadd.f32 %v645_v5, %v1726_v31  ;;  %v781_v27 = vadd.f32 %v780_v47, %v718_v38 }
 0x11a   : > { %v789_v7 = vadd.f32 %v1582_v15, %v725_v59 }
 0x11b   : > { %v647_v40 = vadd.f32 %v646_v9, %v1734_v45  ;;  %v655_v30 = vadd.f32 %v654_v21, %v1744_v62  ;;  %v782_v23 = vadd.f32 %v781_v27, %v719_v2 }
 0x11c   : > { %v790_v36 = vadd.f32 %v789_v7, %v726_v4  ;;  %v1759_v32 = vpop.f32.mrb[20].mxu0 }
 0x11d   : > { %v662_v15 = vadd.f32 %v1612_v33, %v1759_v32  ;;  %v733_v38 = vmul.f32 %v1759_v32, %v1759_v32  ;;  %648 = vadd.xlane.f32.xlu0 %v647_v40  ;;  %v1767_v47 = vpop.f32.mrb[21].mxu0  ;;  %v1769_v5 = vpop.f32.mrb[20].mxu1  ;;  %v656_v59 = vadd.f32 %v655_v30, %v1750_v12  ;;  %v728_v40 = vmul.f32 %v1750_v12, %v1750_v12 }
 0x11e   : > { %v791_v52 = vadd.f32 %v790_v36, %v727_v55  ;;  %v734_v4 = vmul.f32 %v1767_v47, %v1767_v47  ;;  %v1774_v7 = vpop.f32.mrb[22].mxu0  ;;  %v735_v2 = vmul.f32 %v1769_v5, %v1769_v5  ;;  %v1778_v33 = vpop.f32.mrb[21].mxu1  ;;  %v783_v21 = vadd.f32 %v782_v23, %v720_v25 }
 0x11f   : > { %v798_v9 = vadd.f32 %v1615_v35, %v733_v38  ;;  %v663_v36 = vadd.f32 %v662_v15, %v1767_v47  ;;  %v671_v30 = vadd.f32 %v1618_v37, %v1774_v7  ;;  %v741_v55 = vmul.f32 %v1774_v7, %v1774_v7  ;;  %v1788_v27 = vpop.f32.mrb[23].mxu0  ;;  %v1790_v19 = vpop.f32.mrb[22].mxu1 }
 0x120   : > { %v742_v0 = vmul.f32 %v1788_v27, %v1788_v27  ;;  %v1794_v57 = vpop.f32.mrb[23].mxu1  ;;  %v792_v23 = vadd.f32 %v791_v52, %v728_v40  ;;  %v736_v38 = vmul.f32 %v1778_v33, %v1778_v33  ;;  %v743_v52 = vmul.f32 %v1790_v19, %v1790_v19 }
 0x121   : > { %v807_v35 = vadd.f32 %v1630_v43, %v741_v55  ;;  %v672_v25 = vadd.f32 %v671_v30, %v1788_v27  ;;  %657 = vadd.xlane.f32.xlu0 %v656_v59  ;;  %v664_v37 = vadd.f32 %v663_v36, %v1769_v5  ;;  %v799_v15 = vadd.f32 %v798_v9, %v734_v4 }
 0x122   : > { %793 = vadd.xlane.f32.xlu1 %v792_v23 }
 0x123   : > { %v665_v53 = vadd.f32 %v664_v37, %v1778_v33  ;;  %v800_v46 = vadd.f32 %v799_v15, %v735_v2  ;;  %v673_v49 = vadd.f32 %v672_v25, %v1790_v19  ;;  %v808_v42 = vadd.f32 %v807_v35, %v742_v0 }
 0x124   : > { %v1805_v43 = vpop.f32.mrb[24].mxu0 }
 0x125   : > { %2238 = vst [vmem:[#allocation17_spill] sm:$0xff] %v1805_v43  ;;  %v680_v59 = vadd.f32 %v1660_v6, %v1805_v43  ;;  %v749_v4 = vmul.f32 %v1805_v43, %v1805_v43  ;;  %784 = vadd.xlane.f32.xlu0 %v783_v21  ;;  %v1811_v40 = vpop.f32.mrb[25].mxu0  ;;  %v1813_v9 = vpop.f32.mrb[24].mxu1  ;;  %v801_v2 = vadd.f32 %v800_v46, %v736_v38 }
 0x126   : > { %2239 = vst [vmem:[#allocation18_spill] sm:$0xff] %v1811_v40  ;;  %v674_v36 = vadd.f32 %v673_v49, %v1794_v57  ;;  %666 = vadd.xlane.f32.xlu1 %v665_v53  ;;  %v750_v0 = vmul.f32 %v1811_v40, %v1811_v40  ;;  %v1818_v30 = vpop.f32.mrb[26].mxu0  ;;  %v751_v6 = vmul.f32 %v1813_v9, %v1813_v9  ;;  %v1822_v55 = vpop.f32.mrb[25].mxu1 }
 0x127   : > { %2240 = vst [vmem:[#allocation19_spill] sm:$0xff] %v1818_v30  ;;  %v744_v21 = vmul.f32 %v1794_v57, %v1794_v57  ;;  %v809_v23 = vadd.f32 %v808_v42, %v743_v52  ;;  %v816_v35 = vadd.f32 %v1663_v10, %v749_v4  ;;  %v681_v46 = vadd.f32 %v680_v59, %v1811_v40  ;;  %v1832_v25 = vpop.f32.mrb[27].mxu0  ;;  %v1834_v37 = vpop.f32.mrb[26].mxu1 }
 0x128   : > { %v689_v49 = vadd.f32 %v1666_v16, %v1818_v30  ;;  %v757_v53 = vmul.f32 %v1818_v30, %v1818_v30  ;;  %v758_v15 = vmul.f32 %v1832_v25, %v1832_v25  ;;  %v1838_v38 = vpop.f32.mrb[27].mxu1  ;;  %v752_v10 = vmul.f32 %v1822_v55, %v1822_v55 }
 0x129   : > { %v810_v42 = vadd.f32 %v809_v23, %v744_v21  ;;  %802 = vadd.xlane.f32.xlu0 %v801_v2  ;;  %v682_v59 = vadd.f32 %v681_v46, %v1813_v9  ;;  %v817_v4 = vadd.f32 %v816_v35, %v750_v0  ;;  %v759_v30 = vmul.f32 %v1834_v37, %v1834_v37 }
 0x12a   : > { %v825_v52 = vadd.f32 %v1678_v26, %v757_v53  ;;  %v690_v16 = vadd.f32 %v689_v49, %v1832_v25  ;;  %675 = vadd.xlane.f32.xlu1 %v674_v36 }
 0x12b   : > { %v683_v40 = vadd.f32 %v682_v59, %v1822_v55  ;;  %v818_v43 = vadd.f32 %v817_v4, %v751_v6 }
 0x12c   : > { %v691_v21 = vadd.f32 %v690_v16, %v1834_v37  ;;  %v826_v23 = vadd.f32 %v825_v52, %v758_v15  ;;  %v1849_v41 = vpop.f32.mrb[28].mxu0 }
 0x12d   : > { %2241 = vst [vmem:[#allocation20_spill] sm:$0xff] %v1849_v41  ;;  %v698_v26 = vadd.f32 %v1708_v63, %v1849_v41  ;;  %v765_v2 = vmul.f32 %v1849_v41, %v1849_v41  ;;  %684 = vadd.xlane.f32.xlu0 %v683_v40  ;;  %v1855_v0 = vpop.f32.mrb[29].mxu0  ;;  %v1857_v36 = vpop.f32.mrb[28].mxu1  ;;  %v819_v35 = vadd.f32 %v818_v43, %v752_v10 }
 0x12e   : > { %2242 = vst [vmem:[#allocation21_spill] sm:$0xff] %v1855_v0  ;;  %v692_v46 = vadd.f32 %v691_v21, %v1838_v38  ;;  %811 = vadd.xlane.f32.xlu1 %v810_v42  ;;  %v766_v6 = vmul.f32 %v1855_v0, %v1855_v0  ;;  %v1862_v49 = vpop.f32.mrb[30].mxu0  ;;  %v1864_v53 = vpop.f32.mrb[29].mxu1  ;;  %v760_v63 = vmul.f32 %v1838_v38, %v1838_v38 }
 0x12f   : > { %2243 = vst [vmem:[#allocation22_spill] sm:$0xff] %v1862_v49  ;;  %v827_v15 = vadd.f32 %v826_v23, %v759_v30  ;;  %v834_v40 = vadd.f32 %v1711_v3, %v765_v2  ;;  %v699_v52 = vadd.f32 %v698_v26, %v1855_v0  ;;  %v707_v43 = vadd.f32 %v1714_v8, %v1862_v49  ;;  %v1874_v10 = vpop.f32.mrb[31].mxu0  ;;  %v1876_v16 = vpop.f32.mrb[30].mxu1 }
 0x130   : > { %v773_v42 = vmul.f32 %v1862_v49, %v1862_v49  ;;  %v774_v59 = vmul.f32 %v1874_v10, %v1874_v10  ;;  %v767_v30 = vmul.f32 %v1857_v36, %v1857_v36  ;;  %v1882_v4 = vpop.f32.mrb[31].mxu1  ;;  %v775_v23 = vmul.f32 %v1876_v16, %v1876_v16 }
 0x131   : > { %2244 = vst [vmem:[#allocation23_spill] sm:$0xff] %v1882_v4  ;;  %v828_v3 = vadd.f32 %v827_v15, %v760_v63  ;;  %v708_v8 = vadd.f32 %v707_v43, %v1874_v10  ;;  %820 = vadd.xlane.f32.xlu0 %v819_v35  ;;  %v700_v26 = vadd.f32 %v699_v52, %v1857_v36 }
 0x132   : > { %v843_v21 = vadd.f32 %v1728_v34, %v773_v42  ;;  %693 = vadd.xlane.f32.xlu1 %v692_v46  ;;  %v768_v2 = vmul.f32 %v1864_v53, %v1864_v53  ;;  %v835_v49 = vadd.f32 %v834_v40, %v766_v6  ;;  %v776_v34 = vmul.f32 %v1882_v4, %v1882_v4 }
 0x133   : > { %v701_v41 = vadd.f32 %v700_v26, %v1864_v53  ;;  %v709_v63 = vadd.f32 %v708_v8, %v1876_v16 }
 0x134   : > { %v844_v0 = vadd.f32 %v843_v21, %v774_v59  ;;  %v836_v15 = vadd.f32 %v835_v49, %v767_v30 }
 0x135   : > { %702 = vadd.xlane.f32.xlu0 %v701_v41  ;;  %v710_v35 = vadd.f32 %v709_v63, %v1882_v4 }
 0x136   : > { %v845_v43 = vadd.f32 %v844_v0, %v775_v23  ;;  %829 = vadd.xlane.f32.xlu1 %v828_v3  ;;  %v837_v52 = vadd.f32 %v836_v15, %v768_v2 }
 0x138   : > { %v846_v46 = vadd.f32 %v845_v43, %v776_v34 }
 0x139   : > { %838 = vadd.xlane.f32.xlu0 %v837_v52 }
 0x13a   : > { %711 = vadd.xlane.f32.xlu1 %v710_v35 }
 0x13e   : > { %847 = vadd.xlane.f32.xlu1 %v846_v46 }
 0x1aa   : > { %v649_v6 = vpop.xlane.xlu0 %648 }
 0x1ab   : > { %v1896_v42 = vmul.f32 0.0009765625, %v649_v6 }
 0x1ad   : > { %v865_v0 = vmul.f32 %v1896_v42, %v1896_v42 }
 0x1ae   : > { %v658_v40 = vpop.xlane.xlu0 %657 }
 0x1af   : > { %v794_v59 = vpop.xlane.xlu1 %793  ;;  %v1898_v21 = vmul.f32 0.0009765625, %v658_v40 }
 0x1b0   : > { %v858_v49 = vmul.f32 0.0009765625, %v794_v59 }
 0x1b1   : > { %v866_v41 = vmul.f32 %v1898_v21, %v1898_v21 }
 0x1b2   : > { %v785_v30 = vpop.xlane.xlu0 %784 }
 0x1b3   : > { %v874_v8 = vsub.f32 %v858_v49, %v866_v41  ;;  %v857_v3 = vmul.f32 0.0009765625, %v785_v30  ;;  %v667_v23 = vpop.xlane.xlu1 %666 }
 0x1b4   : > { %v1904_v26 = vmul.f32 0.0009765625, %v667_v23 }
 0x1b5   : > { %v882_v2 = vmax.f32 %v874_v8, 0.0  ;;  %v873_v63 = vsub.f32 %v857_v3, %v865_v0 }
 0x1b6   : > { %v803_v15 = vpop.xlane.xlu0 %802  ;;  %v867_v46 = vmul.f32 %v1904_v26, %v1904_v26 }
 0x1b7   : > { %v954_v34 = vadd.f32 1e-05, %v882_v2  ;;  %v881_v35 = vmax.f32 %v873_v63, 0.0  ;;  %v676_v43 = vpop.xlane.xlu1 %675  ;;  %v859_v52 = vmul.f32 0.0009765625, %v803_v15  ;;  %v900_v63 = vsub.f32 %v1559_v1, %v1898_v21 }
 0x1b8   : > { %v1908_v40 = vmul.f32 0.0009765625, %v676_v43 }
 0x1b9   : > { %1361 = vrsqrt.f32 %v954_v34  ;;  %v953_v6 = vadd.f32 1e-05, %v881_v35  ;;  %v875_v49 = vsub.f32 %v859_v52, %v867_v46  ;;  %v897_v35 = vsub.f32 %v1540_v54, %v1898_v21 }
 0x1ba   : > { %v685_v41 = vpop.xlane.xlu0 %684  ;;  %v868_v43 = vmul.f32 %v1908_v40, %v1908_v40  ;;  %v898_v46 = vsub.f32 %v1548_v58, %v1898_v21  ;;  %v901_v34 = vsub.f32 %v1732_v44, %v1898_v21  ;;  %v902_v54 = vsub.f32 %v1742_v61, %v1898_v21 }
 0x1bb   : > { %1363 = vrsqrt.f32 %v953_v6  ;;  %v812_v3 = vpop.xlane.xlu1 %811  ;;  %v883_v15 = vmax.f32 %v875_v49, 0.0  ;;  %v899_v6 = vsub.f32 %v1552_v60, %v1898_v21  ;;  %v1940_v23 = vmul.f32 0.0009765625, %v685_v41 }
 0x1bc   : > { %v860_v52 = vmul.f32 0.0009765625, %v812_v3  ;;  %v903_v58 = vsub.f32 %v1744_v62, %v1898_v21  ;;  %v904_v60 = vsub.f32 %v1750_v12, %v1898_v21 }
 0x1bd   : > { %v955_v49 = vadd.f32 1e-05, %v883_v15  ;;  %v1967_v41 = vmul.f32 %v1940_v23, %v1940_v23 }
 0x1be   : > { %v876_v2 = vsub.f32 %v860_v52, %v868_v43  ;;  %v821_v3 = vpop.xlane.xlu0 %820 }
 0x1bf   : > { %1365 = vrsqrt.f32 %v955_v49  ;;  %v694_v15 = vpop.xlane.xlu1 %693 }
 0x1c0   : > { %v884_v43 = vmax.f32 %v876_v2, 0.0  ;;  %v1969_v2 = vmul.f32 0.0009765625, %v821_v3  ;;  %v1971_v61 = vmul.f32 0.0009765625, %v694_v15 }
 0x1c2   : > { %v1963_v44 = vadd.f32 1e-05, %v884_v43 }
 0x1c3   : > { %v1362_v49 = vpop.eup %1361 }
 0x1c4   : > { %v977_v62 = vmul.f32 %v1362_v49, %v897_v35  ;;  %v978_v1 = vmul.f32 %v1362_v49, %v898_v46  ;;  %v979_v12 = vmul.f32 %v1362_v49, %v899_v6  ;;  %v980_v0 = vmul.f32 %v1362_v49, %v900_v63 }
 0x1c5   : > { %v1364_v8 = vpop.eup %1363  ;;  %v981_v43 = vmul.f32 %v1362_v49, %v901_v34  ;;  %v982_v52 = vmul.f32 %v1362_v49, %v902_v54  ;;  %v983_v3 = vmul.f32 %v1362_v49, %v903_v58  ;;  %v984_v21 = vmul.f32 %v1362_v49, %v904_v60 }
 0x1c6   : > { %v1041_v15 = vmax.f32 %v977_v62, 0.0  ;;  %v1042_v35 = vmax.f32 %v978_v1, 0.0  ;;  %v1043_v46 = vmax.f32 %v979_v12, 0.0  ;;  %v1044_v63 = vmax.f32 %v980_v0, 0.0 }
 0x1c7   : > { %v1045_v6 = vmax.f32 %v981_v43, 0.0  ;;  %v1046_v30 = vmax.f32 %v982_v52, 0.0  ;;  %v1047_v59 = vmax.f32 %v983_v3, 0.0  ;;  %v1048_v4 = vmax.f32 %v984_v21, 0.0 }
 0x1c8   : > { %1105 = vst [vmem:[%s1976_s30 + $0x40] sm:$0xff] %v1041_v15  ;;  %1106 = vst [vmem:[%s1976_s30 + $0x48] sm:$0xff] %v1042_v35  ;;  %v2245_v34 = vsub.f32 %v1528_v48, %v1896_v42  ;;  %v2246_v58 = vsub.f32 %v1532_v50, %v1896_v42  ;;  %v2247_v0 = vsub.f32 %v1534_v51, %v1896_v42  ;;  %1367 = vrsqrt.f32 %v1963_v44 }
 0x1c9   : > { %1107 = vst [vmem:[%s1976_s30 + $0x50] sm:$0xff] %v1043_v46  ;;  %1108 = vst [vmem:[%s1976_s30 + $0x58] sm:$0xff] %v1044_v63  ;;  %v2248_v62 = vsub.f32 %v1544_v56, %v1896_v42  ;;  %v2249_v48 = vsub.f32 %v1718_v17, %v1896_v42  ;;  %v2250_v50 = vsub.f32 %v1724_v28, %v1896_v42 }
 0x1ca   : > { %v969_v54 = vmul.f32 %v1364_v8, %v2245_v34  ;;  %v970_v60 = vmul.f32 %v1364_v8, %v2246_v58  ;;  %v971_v1 = vmul.f32 %v1364_v8, %v2247_v0  ;;  %1109 = vst [vmem:[%s1976_s30 + $0x60] sm:$0xff] %v1045_v6  ;;  %1110 = vst [vmem:[%s1976_s30 + $0x68] sm:$0xff] %v1046_v30 }
 0x1cb   : > { %v972_v12 = vmul.f32 %v1364_v8, %v2248_v62  ;;  %1111 = vst [vmem:[%s1976_s30 + $0x70] sm:$0xff] %v1047_v59  ;;  %1112 = vst [vmem:[%s1976_s30 + $0x78] sm:$0xff] %v1048_v4  ;;  %v973_v21 = vmul.f32 %v1364_v8, %v2249_v48  ;;  %v974_v51 = vmul.f32 %v1364_v8, %v2250_v50  ;;  %v1366_v4 = vpop.eup %1365 }
 0x1cc   : > { %v2251_v52 = vsub.f32 %v1726_v31, %v1896_v42  ;;  %v2252_v59 = vsub.f32 %v1734_v45, %v1896_v42  ;;  %v1033_v49 = vmax.f32 %v969_v54, 0.0  ;;  %v1034_v43 = vmax.f32 %v970_v60, 0.0  ;;  %v830_v31 = vpop.xlane.xlu1 %829 }
 0x1cd   : > { %v1035_v17 = vmax.f32 %v971_v1, 0.0  ;;  %v1036_v3 = vmax.f32 %v972_v12, 0.0  ;;  %v1037_v28 = vmax.f32 %v973_v21, 0.0  ;;  %v1038_v15 = vmax.f32 %v974_v51, 0.0  ;;  %v703_v12 = vpop.xlane.xlu0 %702 }
 0x1ce   : > { %v975_v56 = vmul.f32 %v1364_v8, %v2251_v52  ;;  %v976_v30 = vmul.f32 %v1364_v8, %v2252_v59  ;;  %1097 = vst [vmem:[%s1976_s30] sm:$0xff] %v1033_v49  ;;  %1098 = vst [vmem:[%s1976_s30 + $0x8] sm:$0xff] %v1034_v43  ;;  %v2253_v45 = vsub.f32 %v1574_v11, %v1904_v26  ;;  %v2053_v59 = vmul.f32 0.0009765625, %v703_v12 }
 0x1cf   : > { %1099 = vst [vmem:[%s1976_s30 + $0x10] sm:$0xff] %v1035_v17  ;;  %1100 = vst [vmem:[%s1976_s30 + $0x18] sm:$0xff] %v1036_v3  ;;  %v2254_v8 = vsub.f32 %v1578_v13, %v1904_v26  ;;  %v2255_v6 = vsub.f32 %v1580_v14, %v1904_v26  ;;  %v2256_v54 = vsub.f32 %v1592_v20, %v1904_v26 }
 0x1d0   : > { %v1039_v35 = vmax.f32 %v975_v56, 0.0  ;;  %v1040_v46 = vmax.f32 %v976_v30, 0.0  ;;  %v985_v42 = vmul.f32 %v1366_v4, %v2253_v45  ;;  %1101 = vst [vmem:[%s1976_s30 + $0x20] sm:$0xff] %v1037_v28  ;;  %1102 = vst [vmem:[%s1976_s30 + $0x28] sm:$0xff] %v1038_v15  ;;  %v2257_v11 = vsub.f32 %v1759_v32, %v1904_v26 }
 0x1d1   : > { %v986_v63 = vmul.f32 %v1366_v4, %v2254_v8  ;;  %v987_v34 = vmul.f32 %v1366_v4, %v2255_v6  ;;  %v988_v58 = vmul.f32 %v1366_v4, %v2256_v54  ;;  %v2258_v60 = vsub.f32 %v1767_v47, %v1904_v26  ;;  %v839_v49 = vpop.xlane.xlu0 %838  ;;  %v2262_v6 = vld [vmem:[#allocation3_spill] sm:$0xff] }
 0x1d2   : > { %1103 = vst [vmem:[%s1976_s30 + $0x30] sm:$0xff] %v1039_v35  ;;  %1104 = vst [vmem:[%s1976_s30 + $0x38] sm:$0xff] %v1040_v46  ;;  %v989_v13 = vmul.f32 %v1366_v4, %v2257_v11  ;;  %v2259_v20 = vsub.f32 %v1769_v5, %v1904_v26  ;;  %v2260_v1 = vsub.f32 %v1778_v33, %v1904_v26  ;;  %v1049_v48 = vmax.f32 %v985_v42, 0.0  ;;  %v712_v33 = vpop.xlane.xlu1 %711 }
 0x1d3   : > { %v990_v14 = vmul.f32 %v1366_v4, %v2258_v60  ;;  %v1050_v32 = vmax.f32 %v986_v63, 0.0  ;;  %v1051_v21 = vmax.f32 %v987_v34, 0.0  ;;  %v1052_v50 = vmax.f32 %v988_v58, 0.0 }
 0x1d4   : > { %v991_v0 = vmul.f32 %v1366_v4, %v2259_v20  ;;  %v992_v62 = vmul.f32 %v1366_v4, %v2260_v1  ;;  %v1053_v47 = vmax.f32 %v989_v13, 0.0  ;;  %1113 = vst [vmem:[%s1976_s30 + $0x80] sm:$0xff] %v1049_v48  ;;  %v877_v5 = vsub.f32 %v1969_v2, %v1967_v41 }
 0x1d5   : > { %v1054_v51 = vmax.f32 %v990_v14, 0.0  ;;  %1114 = vst [vmem:[%s1976_s30 + $0x88] sm:$0xff] %v1050_v32  ;;  %1115 = vst [vmem:[%s1976_s30 + $0x90] sm:$0xff] %v1051_v21  ;;  %v870_v30 = vmul.f32 %v1971_v61, %v1971_v61  ;;  %v862_v4 = vmul.f32 0.0009765625, %v830_v31  ;;  %v913_v44 = vsub.f32 %v1588_v18, %v1908_v40 }
 0x1d6   : > { %v1055_v52 = vmax.f32 %v991_v0, 0.0  ;;  %v1056_v56 = vmax.f32 %v992_v62, 0.0  ;;  %1116 = vst [vmem:[%s1976_s30 + $0x98] sm:$0xff] %v1052_v50  ;;  %1117 = vst [vmem:[%s1976_s30 + $0xa0] sm:$0xff] %v1053_v47  ;;  %v885_v26 = vmax.f32 %v877_v5, 0.0  ;;  %v871_v41 = vmul.f32 %v2053_v59, %v2053_v59  ;;  %v848_v31 = vpop.xlane.xlu1 %847  ;;  %v2263_v47 = vld [vmem:[#allocation5_spill] sm:$0xff] }
 0x1d7   : > { %1118 = vst [vmem:[%s1976_s30 + $0xa8] sm:$0xff] %v1054_v51  ;;  %v878_v17 = vsub.f32 %v862_v4, %v870_v30  ;;  %v863_v2 = vmul.f32 0.0009765625, %v839_v49  ;;  %v2061_v3 = vmul.f32 0.0009765625, %v712_v33  ;;  %v914_v28 = vsub.f32 %v1596_v22, %v1908_v40  ;;  %v2265_v5 = vld [vmem:[#allocation18_spill] sm:$0xff] }
 0x1d8   : > { %1119 = vst [vmem:[%s1976_s30 + $0xb0] sm:$0xff] %v1055_v52  ;;  %1120 = vst [vmem:[%s1976_s30 + $0xb8] sm:$0xff] %v1056_v56  ;;  %v957_v43 = vadd.f32 1e-05, %v885_v26  ;;  %v915_v15 = vsub.f32 %v1600_v24, %v1908_v40  ;;  %v916_v35 = vsub.f32 %v1607_v29, %v1908_v40  ;;  %v917_v18 = vsub.f32 %v1774_v7, %v1908_v40  ;;  %v2261_v29 = vld [vmem:[#allocation2_spill] sm:$0xff]  ;;  %v1368_v7 = vpop.eup %1367  ;;  %v2264_v52 = vld [vmem:[#allocation17_spill] sm:$0xff] }
 0x1d9   : > { %v886_v46 = vmax.f32 %v878_v17, 0.0  ;;  %v918_v45 = vsub.f32 %v1788_v27, %v1908_v40  ;;  %v919_v42 = vsub.f32 %v1790_v19, %v1908_v40  ;;  %v879_v8 = vsub.f32 %v863_v2, %v871_v41 }
 0x1da   : > { %1369 = vrsqrt.f32 %v957_v43  ;;  %v920_v22 = vsub.f32 %v1794_v57, %v1908_v40  ;;  %v921_v24 = vsub.f32 %v1622_v39, %v1940_v23  ;;  %v922_v63 = vsub.f32 %v2261_v29, %v1940_v23  ;;  %v2267_v29 = vld [vmem:[#allocation6_spill] sm:$0xff] }
 0x1db   : > { %v923_v34 = vsub.f32 %v2262_v6, %v1940_v23  ;;  %v958_v54 = vadd.f32 1e-05, %v886_v46  ;;  %v887_v58 = vmax.f32 %v879_v8, 0.0  ;;  %v872_v27 = vmul.f32 %v2061_v3, %v2061_v3 }
 0x1dc   : > { %v864_v19 = vmul.f32 0.0009765625, %v848_v31  ;;  %v993_v11 = vmul.f32 %v1368_v7, %v913_v44  ;;  %v994_v13 = vmul.f32 %v1368_v7, %v914_v28  ;;  %v995_v57 = vmul.f32 %v1368_v7, %v915_v15 }
 0x1dd   : > { %v996_v39 = vmul.f32 %v1368_v7, %v916_v35  ;;  %v997_v40 = vmul.f32 %v1368_v7, %v917_v18  ;;  %v998_v60 = vmul.f32 %v1368_v7, %v918_v45  ;;  %v999_v14 = vmul.f32 %v1368_v7, %v919_v42 }
 0x1de   : > { %v1000_v20 = vmul.f32 %v1368_v7, %v920_v22  ;;  %v1057_v0 = vmax.f32 %v993_v11, 0.0  ;;  %v1058_v1 = vmax.f32 %v994_v13, 0.0  ;;  %v1059_v62 = vmax.f32 %v995_v57, 0.0  ;;  %v2266_v22 = vld [vmem:[#allocation4_spill] sm:$0xff] }
 0x1df   : > { %v1060_v12 = vmax.f32 %v996_v39, 0.0  ;;  %v1061_v48 = vmax.f32 %v997_v40, 0.0  ;;  %v1062_v32 = vmax.f32 %v998_v60, 0.0  ;;  %v1063_v21 = vmax.f32 %v999_v14, 0.0  ;;  %v2271_v39 = vld [vmem:[#allocation9_spill] sm:$0xff]  ;;  %v2272_v14 = vld [vmem:[#allocation10_spill] sm:$0xff] }
 0x1e0   : > { %v1064_v50 = vmax.f32 %v1000_v20, 0.0  ;;  %1121 = vst [vmem:[%s1976_s30 + $0xc0] sm:$0xff] %v1057_v0  ;;  %1122 = vst [vmem:[%s1976_s30 + $0xc8] sm:$0xff] %v1058_v1  ;;  %v924_v51 = vsub.f32 %v2263_v47, %v1940_v23  ;;  %v925_v56 = vsub.f32 %v2264_v52, %v1940_v23  ;;  %v926_v33 = vsub.f32 %v2265_v5, %v1940_v23  ;;  %v2273_v0 = vld [vmem:[#allocation11_spill] sm:$0xff] }
 0x1e1   : > { %1123 = vst [vmem:[%s1976_s30 + $0xd0] sm:$0xff] %v1059_v62  ;;  %1124 = vst [vmem:[%s1976_s30 + $0xd8] sm:$0xff] %v1060_v12  ;;  %1371 = vrsqrt.f32 %v958_v54  ;;  %v927_v30 = vsub.f32 %v1813_v9, %v1940_v23  ;;  %v928_v4 = vsub.f32 %v1822_v55, %v1940_v23  ;;  %v959_v49 = vadd.f32 1e-05, %v887_v58  ;;  %v2269_v54 = vld [vmem:[#allocation8_spill] sm:$0xff]  ;;  %v2274_v62 = vld [vmem:[#allocation13_spill] sm:$0xff] }
 0x1e2   : > { %1125 = vst [vmem:[%s1976_s30 + $0xe0] sm:$0xff] %v1061_v48  ;;  %1126 = vst [vmem:[%s1976_s30 + $0xe8] sm:$0xff] %v1062_v32  ;;  %v880_v43 = vsub.f32 %v864_v19, %v872_v27  ;;  %v932_v58 = vsub.f32 %v2269_v54, %v1971_v61  ;;  %v2270_v27 = vld [vmem:[#allocation19_spill] sm:$0xff]  ;;  %v934_v11 = vsub.f32 %v1832_v25, %v1971_v61  ;;  %v2275_v25 = vld [vmem:[#allocation20_spill] sm:$0xff] }
 0x1e3   : > { %1127 = vst [vmem:[%s1976_s30 + $0xf0] sm:$0xff] %v1063_v21  ;;  %1128 = vst [vmem:[%s1976_s30 + $0xf8] sm:$0xff] %v1064_v50  ;;  %1373 = vrsqrt.f32 %v959_v49  ;;  %v933_v19 = vsub.f32 %v2270_v27, %v1971_v61  ;;  %v935_v13 = vsub.f32 %v1834_v37, %v1971_v61  ;;  %v936_v57 = vsub.f32 %v1838_v38, %v1971_v61  ;;  %v2276_v32 = vld [vmem:[#allocation21_spill] sm:$0xff] }
 0x1e4   : > { %v1370_v26 = vpop.eup %1369  ;;  %v888_v6 = vmax.f32 %v880_v43, 0.0  ;;  %v937_v40 = vsub.f32 %v2271_v39, %v2053_v59  ;;  %v938_v20 = vsub.f32 %v2272_v14, %v2053_v59  ;;  %v939_v1 = vsub.f32 %v2273_v0, %v2053_v59 }
 0x1e5   : > { %v1001_v44 = vmul.f32 %v1370_v26, %v921_v24  ;;  %v1002_v17 = vmul.f32 %v1370_v26, %v922_v63  ;;  %v1003_v41 = vmul.f32 %v1370_v26, %v923_v34  ;;  %v1004_v2 = vmul.f32 %v1370_v26, %v924_v51  ;;  %v2268_v34 = vld [vmem:[#allocation7_spill] sm:$0xff] }
 0x1e6   : > { %v1005_v28 = vmul.f32 %v1370_v26, %v925_v56  ;;  %v1006_v15 = vmul.f32 %v1370_v26, %v926_v33  ;;  %v1007_v35 = vmul.f32 %v1370_v26, %v927_v30  ;;  %v1008_v46 = vmul.f32 %v1370_v26, %v928_v4 }
 0x1e7   : > { %v1065_v31 = vmax.f32 %v1001_v44, 0.0  ;;  %v1066_v9 = vmax.f32 %v1002_v17, 0.0  ;;  %v1067_v18 = vmax.f32 %v1003_v41, 0.0  ;;  %v1068_v55 = vmax.f32 %v1004_v2, 0.0  ;;  %v2277_v17 = vld [vmem:[#allocation12_spill] sm:$0xff]  ;;  %v2278_v2 = vld [vmem:[#allocation14_spill] sm:$0xff] }
 0x1e8   : > { %v1069_v23 = vmax.f32 %v1005_v28, 0.0  ;;  %v1070_v45 = vmax.f32 %v1006_v15, 0.0  ;;  %v1071_v42 = vmax.f32 %v1007_v35, 0.0  ;;  %v1072_v8 = vmax.f32 %v1008_v46, 0.0  ;;  %v2279_v15 = vld [vmem:[#allocation15_spill] sm:$0xff]  ;;  %v2280_v46 = vld [vmem:[#allocation16_spill] sm:$0xff] }
 0x1e9   : > { %1129 = vst [vmem:[%s1976_s30 + $0x100] sm:$0xff] %v1065_v31  ;;  %1130 = vst [vmem:[%s1976_s30 + $0x108] sm:$0xff] %v1066_v9  ;;  %v929_v24 = vsub.f32 %v2266_v22, %v1971_v61  ;;  %v930_v63 = vsub.f32 %v2267_v29, %v1971_v61  ;;  %v931_v7 = vsub.f32 %v2268_v34, %v1971_v61  ;;  %v960_v60 = vadd.f32 1e-05, %v888_v6 }
 0x1ea   : > { %1131 = vst [vmem:[%s1976_s30 + $0x110] sm:$0xff] %v1067_v18  ;;  %1132 = vst [vmem:[%s1976_s30 + $0x118] sm:$0xff] %v1068_v55  ;;  %v940_v12 = vsub.f32 %v2274_v62, %v2053_v59  ;;  %v941_v48 = vsub.f32 %v2275_v25, %v2053_v59  ;;  %v942_v38 = vsub.f32 %v2276_v32, %v2053_v59  ;;  %v2281_v18 = vld [vmem:[#allocation22_spill] sm:$0xff] }
 0x1eb   : > { %1133 = vst [vmem:[%s1976_s30 + $0x120] sm:$0xff] %v1069_v23  ;;  %1134 = vst [vmem:[%s1976_s30 + $0x128] sm:$0xff] %v1070_v45  ;;  %v1372_v37 = vpop.eup %1371  ;;  %v943_v61 = vsub.f32 %v1857_v36, %v2053_v59  ;;  %v944_v21 = vsub.f32 %v1864_v53, %v2053_v59  ;;  %1375 = vrsqrt.f32 %v960_v60  ;;  %v945_v41 = vsub.f32 %v2277_v17, %v2061_v3 }
 0x1ec   : > { %1135 = vst [vmem:[%s1976_s30 + $0x130] sm:$0xff] %v1071_v42  ;;  %1136 = vst [vmem:[%s1976_s30 + $0x138] sm:$0xff] %v1072_v8  ;;  %v1009_v50 = vmul.f32 %v1372_v37, %v929_v24  ;;  %v1010_v47 = vmul.f32 %v1372_v37, %v930_v63  ;;  %v1011_v51 = vmul.f32 %v1372_v37, %v931_v7  ;;  %v2282_v42 = vld [vmem:[#allocation23_spill] sm:$0xff] }
 0x1ed   : > { %v1012_v52 = vmul.f32 %v1372_v37, %v932_v58  ;;  %v1013_v56 = vmul.f32 %v1372_v37, %v933_v19  ;;  %v1014_v5 = vmul.f32 %v1372_v37, %v934_v11  ;;  %v1015_v33 = vmul.f32 %v1372_v37, %v935_v13  ;;  %v1374_v9 = vpop.eup %1373 }
 0x1ee   : > { %v1016_v26 = vmul.f32 %v1372_v37, %v936_v57  ;;  %v1073_v30 = vmax.f32 %v1009_v50, 0.0  ;;  %v1074_v4 = vmax.f32 %v1010_v47, 0.0  ;;  %v1075_v36 = vmax.f32 %v1011_v51, 0.0 }
 0x1ef   : > { %v1076_v49 = vmax.f32 %v1012_v52, 0.0  ;;  %v1077_v53 = vmax.f32 %v1013_v56, 0.0  ;;  %v1078_v59 = vmax.f32 %v1014_v5, 0.0  ;;  %v1079_v43 = vmax.f32 %v1015_v33, 0.0 }
 0x1f0   : > { %v1080_v44 = vmax.f32 %v1016_v26, 0.0  ;;  %1137 = vst [vmem:[%s1976_s30 + $0x140] sm:$0xff] %v1073_v30  ;;  %1138 = vst [vmem:[%s1976_s30 + $0x148] sm:$0xff] %v1074_v4  ;;  %v946_v28 = vsub.f32 %v2278_v2, %v2061_v3  ;;  %v947_v35 = vsub.f32 %v2279_v15, %v2061_v3  ;;  %v948_v31 = vsub.f32 %v2280_v46, %v2061_v3 }
 0x1f1   : > { %1139 = vst [vmem:[%s1976_s30 + $0x150] sm:$0xff] %v1075_v36  ;;  %1140 = vst [vmem:[%s1976_s30 + $0x158] sm:$0xff] %v1076_v49  ;;  %v949_v55 = vsub.f32 %v2281_v18, %v2061_v3  ;;  %v950_v23 = vsub.f32 %v1874_v10, %v2061_v3  ;;  %v951_v45 = vsub.f32 %v1876_v16, %v2061_v3 }
 0x1f2   : > { %1141 = vst [vmem:[%s1976_s30 + $0x160] sm:$0xff] %v1077_v53  ;;  %1142 = vst [vmem:[%s1976_s30 + $0x168] sm:$0xff] %v1078_v59  ;;  %v952_v8 = vsub.f32 %v2282_v42, %v2061_v3  ;;  %v1017_v22 = vmul.f32 %v1374_v9, %v937_v40  ;;  %v1018_v24 = vmul.f32 %v1374_v9, %v938_v20 }
 0x1f3   : > { %1143 = vst [vmem:[%s1976_s30 + $0x170] sm:$0xff] %v1079_v43  ;;  %1144 = vst [vmem:[%s1976_s30 + $0x178] sm:$0xff] %v1080_v44  ;;  %v1019_v29 = vmul.f32 %v1374_v9, %v939_v1  ;;  %v1020_v63 = vmul.f32 %v1374_v9, %v940_v12  ;;  %v1021_v6 = vmul.f32 %v1374_v9, %v941_v48 }
 0x1f4   : > { %v1022_v34 = vmul.f32 %v1374_v9, %v942_v38  ;;  %v1023_v7 = vmul.f32 %v1374_v9, %v943_v61  ;;  %v1024_v54 = vmul.f32 %v1374_v9, %v944_v21  ;;  %v1081_v58 = vmax.f32 %v1017_v22, 0.0 }
 0x1f5   : > { %v1082_v10 = vmax.f32 %v1018_v24, 0.0  ;;  %v1083_v27 = vmax.f32 %v1019_v29, 0.0  ;;  %v1084_v16 = vmax.f32 %v1020_v63, 0.0  ;;  %v1376_v3 = vpop.eup %1375  ;;  %v1085_v19 = vmax.f32 %v1021_v6, 0.0 }
 0x1f6   : > { %v1086_v11 = vmax.f32 %v1022_v34, 0.0  ;;  %v1087_v13 = vmax.f32 %v1023_v7, 0.0  ;;  %v1088_v57 = vmax.f32 %v1024_v54, 0.0  ;;  %1145 = vst [vmem:[%s1976_s30 + $0x180] sm:$0xff] %v1081_v58  ;;  %v1025_v39 = vmul.f32 %v1376_v3, %v945_v41 }
 0x1f7   : > { %1146 = vst [vmem:[%s1976_s30 + $0x188] sm:$0xff] %v1082_v10  ;;  %1147 = vst [vmem:[%s1976_s30 + $0x190] sm:$0xff] %v1083_v27  ;;  %v1026_v40 = vmul.f32 %v1376_v3, %v946_v28  ;;  %v1027_v60 = vmul.f32 %v1376_v3, %v947_v35  ;;  %v1028_v14 = vmul.f32 %v1376_v3, %v948_v31 }
 0x1f8   : > { %1148 = vst [vmem:[%s1976_s30 + $0x198] sm:$0xff] %v1084_v16  ;;  %1149 = vst [vmem:[%s1976_s30 + $0x1a0] sm:$0xff] %v1085_v19  ;;  %v1029_v20 = vmul.f32 %v1376_v3, %v949_v55  ;;  %v1030_v0 = vmul.f32 %v1376_v3, %v950_v23  ;;  %v1031_v1 = vmul.f32 %v1376_v3, %v951_v45  ;;  %v1089_v12 = vmax.f32 %v1025_v39, 0.0 }
 0x1f9   : > { %1150 = vst [vmem:[%s1976_s30 + $0x1a8] sm:$0xff] %v1086_v11  ;;  %1151 = vst [vmem:[%s1976_s30 + $0x1b0] sm:$0xff] %v1087_v13  ;;  %v1032_v62 = vmul.f32 %v1376_v3, %v952_v8  ;;  %v1090_v25 = vmax.f32 %v1026_v40, 0.0  ;;  %v1091_v48 = vmax.f32 %v1027_v60, 0.0  ;;  %v1092_v37 = vmax.f32 %v1028_v14, 0.0 }
 0x1fa   : > { %1152 = vst [vmem:[%s1976_s30 + $0x1b8] sm:$0xff] %v1088_v57  ;;  %v1093_v32 = vmax.f32 %v1029_v20, 0.0  ;;  %v1094_v38 = vmax.f32 %v1030_v0, 0.0  ;;  %v1095_v61 = vmax.f32 %v1031_v1, 0.0  ;;  %1153 = vst [vmem:[%s1976_s30 + $0x1c0] sm:$0xff] %v1089_v12 }
 0x1fb   : > { %v1096_v21 = vmax.f32 %v1032_v62, 0.0  ;;  %1154 = vst [vmem:[%s1976_s30 + $0x1c8] sm:$0xff] %v1090_v25  ;;  %1155 = vst [vmem:[%s1976_s30 + $0x1d0] sm:$0xff] %v1091_v48 }
 0x1fc   : > { %1156 = vst [vmem:[%s1976_s30 + $0x1d8] sm:$0xff] %v1092_v37  ;;  %1157 = vst [vmem:[%s1976_s30 + $0x1e0] sm:$0xff] %v1093_v32 }
 0x1fd   : > { %1158 = vst [vmem:[%s1976_s30 + $0x1e8] sm:$0xff] %v1094_v38  ;;  %1159 = vst [vmem:[%s1976_s30 + $0x1f0] sm:$0xff] %v1095_v61 }
 0x1fe   : > { %1160 = vst [vmem:[%s1976_s30 + $0x1f8] sm:$0xff] %v1096_v21 }
 0x1ff PF: > { %s12_s13 = sadd.s32 1, %s1415_s13   ;;  %s2283_s9 = smov %s1407_s11 }
 0x200   : > { %p9_p7 = scmp.ge.s32.totalorder %s12_s13, 6   ;;  %s2284_s10 = smov %s1411_s12 }
 0x201   : > { %s2285_s11 = smov %s2288_s14  ;;  %s2286_s12 = smov %s2292_s15 }
 0x202   :  { %11 = sbr.rel (!%p9_p7) target bundleno = 3 (0x3), region = 61 }

</bundles_post_ra>
